<compile_context>
chip_gen: v5e
topology: v5e:2x2
jax: 0.10.0
libtpu: 0.0.40
codegen_flags: <defaults>
</compile_context>

<pallas_src>
import functools

import jax
import jax.numpy as jnp
from jax.experimental import pallas as pl
from jax.experimental.pallas import tpu as pltpu


def _round_up(x, m):
    return -(-x // m) * m


# ----------------------------- Pallas kernel --------------------------------
def _tconv_kernel(x_ref, w_ref, b_ref, o_ref, xim_ref, *, Kt, act_func):
    # x_ref   : (b_tile, T, V*c_in)          bf16, channel-last input slab (read from HBM once)
    # w_ref   : (Kt*V*c_in, n_lanes)         bf16, fused (P|Q) block-diag weight, align folded
    # b_ref   : (1, n_lanes)                 f32 fused bias (align bias folded into P half)
    # o_ref   : (b_tile, T_out, vco_pad)     lane-dense output block (vco_pad % 128 == 0)
    # xim_ref : (b_tile*T_out, Kt*V*c_in)    VMEM im2col scratch
    b_tile, T_out, vco_pad = o_ref.shape
    vci = x_ref.shape[2]

    # One-shot im2col of the resident tile: Kt shifted copies side-by-side on lanes, batches
    # stacked along rows, so a single MXU dot sees M = b_tile*T_out rows and K = Kt*V*c_in.
    for bt in range(b_tile):                      # static unroll; b_tile is small
        for dt in range(Kt):
            xim_ref[bt * T_out:(bt + 1) * T_out, dt * vci:(dt + 1) * vci] = \
                x_ref[bt, dt:dt + T_out, :]

    # Single fused MXU dot (P and Q halves live side by side on the lane axis), f32 accumulate.
    z = jnp.dot(xim_ref[...], w_ref[...], preferred_element_type=jnp.float32) + b_ref[...]

    if act_func in ("glu", "gtu"):
        x_p = z[:, :vco_pad]                      # split at a 128-lane boundary
        gate = jax.nn.sigmoid(z[:, vco_pad:])
        out = (x_p if act_func == "glu" else jnp.tanh(x_p)) * gate
    elif act_func == "relu":
        out = jnp.maximum(z, 0.0)
    elif act_func == "silu":
        out = z * jax.nn.sigmoid(z)
    else:
        raise NotImplementedError(f"act_func {act_func} is not implemented")

    out = out.astype(o_ref.dtype)
    for bt in range(b_tile):                      # lane-dense (multiple-of-128) stores
        o_ref[bt] = out[bt * T_out:(bt + 1) * T_out, :]


# --------------------------- batch-tile heuristic -----------------------------
def _pick_batch_tile(B, T_out, target_m=128):
    """Batches packed per grid step. M = b_tile*T_out rows feed a single MXU dot; aim for
    ~target_m rows (fills MXU rows, amortizes ~0.35us/step pipeline overhead) without going far
    past it (f32 result rows would spill the 64-vreg file), and keep >= 2 grid steps so both
    v7x TensorCores get work under dimension_semantics=("parallel",)."""
    divs = [d for d in range(1, B + 1) if B % d == 0]
    cands = [d for d in divs if B // d >= 2] or divs
    for d in cands:                               # ascending: smallest tile reaching target
        if target_m <= d * T_out <= 2 * target_m:
            return d
    fitting = [d for d in cands if d * T_out <= 2 * target_m]
    return fitting[-1] if fitting else cands[0]


# ------------------------------ JAX wrapper ----------------------------------
def temporal_conv_layer(x, w_conv4, b_conv, w_align, b_align, *, Kt, c_out, act_func,
                        compute_dtype=jnp.bfloat16, out_dtype=jnp.bfloat16):
    """x: (B, c_in, T, V) NCHW.  w_conv4: (N, c_in, Kt, 1) torch conv weight.
       w_align: (c_in, c_out) (identity / zero-pad baked in when c_in <= c_out), b_align: (c_out,).
       Returns (B, c_out, T - Kt + 1, V) like the PyTorch module (in out_dtype)."""
    B, c_in, T, V = x.shape
    T_out = T - Kt + 1
    gated = act_func in ("glu", "gtu")
    n_half = 2 if gated else 1

    vci = V * c_in
    vco = V * c_out
    vco_pad = _round_up(vco, 128)                 # lane-dense output stores for every config
    n_lanes = n_half * vco_pad

    # --- per-tap conv weights (Kt, c_in, N); fold align into the dt = Kt-1 tap of the P half ---
    w_taps = jnp.transpose(w_conv4[:, :, :, 0], (2, 1, 0)).astype(jnp.float32)   # (Kt, c_in, N)
    w_p = w_taps[:, :, :c_out].at[Kt - 1].add(w_align.astype(jnp.float32))
    b_p = b_conv[:c_out].astype(jnp.float32) + b_align.astype(jnp.float32)

    eye_v = jnp.eye(V, dtype=jnp.float32)

    def blockdiag_pad(w):      # (Kt, c_in, c_out) -> (Kt, V*c_in, vco_pad), kron(I_V, w[dt])
        bd = jnp.einsum("uv,kio->kuivo", eye_v, w).reshape(Kt, vci, vco)
        return jnp.pad(bd, ((0, 0), (0, 0), (0, vco_pad - vco)))

    def bias_pad(b):           # (c_out,) -> (vco_pad,)
        return jnp.pad(jnp.tile(b, V), (0, vco_pad - vco))

    halves_w = [blockdiag_pad(w_p)]
    halves_b = [bias_pad(b_p)]
    if gated:
        halves_w.append(blockdiag_pad(w_taps[:, :, c_out:]))
        halves_b.append(bias_pad(b_conv[c_out:].astype(jnp.float32)))

    # Fused (P|Q) weight/bias: one MXU dot per grid step covers both halves.
    w_fused = jnp.concatenate(halves_w, axis=-1).reshape(Kt * vci, n_lanes).astype(compute_dtype)
    b_fused = jnp.concatenate(halves_b, axis=-1).reshape(1, n_lanes)              # f32

    # Channel-last, vertex-major lanes; read from HBM exactly once by the kernel.
    # (Keeping activations in (B, T, V*c) between STGCN layers would remove this transpose and
    #  the final one below; they are kept here only to honor the module's NCHW contract.)
    x_cl = jnp.transpose(x, (0, 2, 3, 1)).reshape(B, T, vci).astype(compute_dtype)

    b_tile = _pick_batch_tile(B, T_out)
    grid = (B // b_tile,)

    in_specs = [
        pl.BlockSpec((b_tile, T, vci), lambda b: (b, 0, 0)),
        pl.BlockSpec((Kt * vci, n_lanes), lambda b: (0, 0)),     # constant index map
        pl.BlockSpec((1, n_lanes), lambda b: (0, 0)),            # constant index map
    ]
    out_specs = pl.BlockSpec((b_tile, T_out, vco_pad), lambda b: (b, 0, 0))

    # VMEM budget (double-buffered pipeline blocks + im2col scratch); keep within v7x's 64 MiB.
    in_item = jnp.dtype(compute_dtype).itemsize
    out_item = jnp.dtype(out_dtype).itemsize
    vmem_need = (2 * b_tile * T * vci * in_item
                 + 2 * b_tile * T_out * vco_pad * out_item
                 + 2 * (Kt * vci * n_lanes * in_item + n_lanes * 4)
                 + b_tile * T_out * Kt * vci * in_item)
    vmem_limit = int(min(64 * 2 ** 20, max(32 * 2 ** 20, 1.3 * vmem_need)))

    # True conv FLOPs (not the structurally-zero block-diagonal MACs).
    flops = 2 * B * T_out * V * (n_half * c_out) * (Kt * c_in)
    transcendentals = {"glu": 1, "gtu": 2, "relu": 0, "silu": 1}[act_func] * B * T_out * vco
    bytes_accessed = (B * T * vci * in_item
                      + Kt * vci * n_lanes * in_item + n_lanes * 4
                      + B * T_out * vco_pad * out_item)

    out_flat = pl.pallas_call(
        functools.partial(_tconv_kernel, Kt=Kt, act_func=act_func),
        out_shape=jax.ShapeDtypeStruct((B, T_out, vco_pad), out_dtype),
        grid=grid,
        in_specs=in_specs,
        out_specs=out_specs,
        scratch_shapes=[pltpu.VMEM((b_tile * T_out, Kt * vci), compute_dtype)],
        compiler_params=pltpu.CompilerParams(
            dimension_semantics=("parallel",),
            vmem_limit_bytes=vmem_limit),
        cost_estimate=pl.CostEstimate(flops=flops, transcendentals=transcendentals,
                                      bytes_accessed=bytes_accessed),
    )(x_cl, w_fused, b_fused)

    out = out_flat[:, :, :vco].reshape(B, T_out, V, c_out)
    return jnp.transpose(out, (0, 3, 1, 2))       # back to NCHW to match the PyTorch module


# --------------------------- parameter construction --------------------------
def init_params(key, Kt, c_in, c_out, act_func):
    """Deterministic synthetic parameters matching the nn.Module shapes."""
    N = 2 * c_out if act_func in ("glu", "gtu") else c_out
    k1, k2, k3, k4 = jax.random.split(key, 4)

    w_conv4 = jax.random.normal(k1, (N, c_in, Kt, 1), jnp.float32) * 0.1
    b_conv = jax.random.normal(k2, (N,), jnp.float32) * 0.1

    # Align: c_in > c_out -> 1x1 conv; c_in <= c_out -> identity / zero-pad (no bias)
    if c_in > c_out:
        wa4 = jax.random.normal(k3, (c_out, c_in, 1, 1), jnp.float32) * 0.1
        w_align = jnp.transpose(wa4[:, :, 0, 0], (1, 0))            # (c_in, c_out)
        b_align = jax.random.normal(k4, (c_out,), jnp.float32) * 0.1
    else:
        w_align = jnp.eye(c_in, c_out, dtype=jnp.float32)
        b_align = jnp.zeros((c_out,), jnp.float32)
    return w_conv4, b_conv, w_align, b_align


# ------------------------------- reference -----------------------------------
def ref_forward(x, w_conv4, b_conv, w_align, b_align, Kt, c_in, c_out, act_func):
    B, _, T, V = x.shape
    T_out = T - Kt + 1
    N = w_conv4.shape[0]
    conv = jnp.zeros((B, N, T_out, V), jnp.float32)
    for dt in range(Kt):
        conv = conv + jnp.einsum("nc,bctv->bntv",
                                 w_conv4[:, :, dt, 0], x[:, :, dt:dt + T_out, :])
    conv = conv + b_conv[None, :, None, None]

    xs = x[:, :, Kt - 1:, :]
    x_in = jnp.einsum("co,bctv->botv", w_align, xs) + b_align[None, :, None, None]

    if act_func in ("glu", "gtu"):
        x_p, x_q = conv[:, :c_out], conv[:, -c_out:]
        if act_func == "glu":
            return (x_p + x_in) * jax.nn.sigmoid(x_q)
        return jnp.tanh(x_p + x_in) * jax.nn.sigmoid(x_q)
    if act_func == "relu":
        return jnp.maximum(conv + x_in, 0.0)
    if act_func == "silu":
        z = conv + x_in
        return z * jax.nn.sigmoid(z)
    raise NotImplementedError(act_func)


# ---------------------------------- main --------------------------------------
if __name__ == "__main__":
    def run_case(act_func, B, c_in, T, V, Kt, c_out, seed):
        key = jax.random.PRNGKey(seed)
        kx, kp = jax.random.split(key)
        x = jax.random.normal(kx, (B, c_in, T, V), jnp.float32)
        w_conv4, b_conv, w_align, b_align = init_params(kp, Kt, c_in, c_out, act_func)

        out = temporal_conv_layer(x, w_conv4, b_conv, w_align, b_align,
                                  Kt=Kt, c_out=c_out, act_func=act_func)
        out = jax.block_until_ready(out)

        ref = ref_forward(x, w_conv4, b_conv, w_align, b_align, Kt, c_in, c_out, act_func)
        assert out.shape == (B, c_out, T - Kt + 1, V), (act_func, out.shape)
        err = float(jnp.max(jnp.abs(out.astype(jnp.float32) - ref)))
        # bf16 MXU operands + bf16 output store, f32 accumulation/activations
        assert err < 5e-2, (act_func, err)

    # GLU with zero-pad align (c_in < c_out); fused P|Q -> 256 output lanes in one dot.
    run_case("glu", B=2, c_in=4, T=16, V=16, Kt=3, c_out=8, seed=0)
    # ReLU with a real 1x1-conv align (c_in > c_out); V*c_out=64 -> output lanes padded to 128.
    run_case("relu", B=2, c_in=8, T=16, V=16, Kt=3, c_out=4, seed=1)

    print("KERNEL_OK")
</pallas_src>

<mosaic_0001>
module attributes {stable_mosaic.version = 11 : i64} {
  func.func @_tconv_kernel(%arg0: i32, %arg1: memref<1x16x64xbf16, #tpu.memory_space<vmem>>, %arg2: memref<192x256xbf16, #tpu.memory_space<vmem>>, %arg3: memref<1x256xf32, #tpu.memory_space<vmem>>, %arg4: memref<1x14x128xbf16, #tpu.memory_space<vmem>>, %arg5: memref<14x192xbf16, #tpu.memory_space<vmem>>) attributes {dimension_semantics = [#tpu.dimension_semantics<parallel>], iteration_bounds = array<i64: 2>, scalar_prefetch = 0 : i64, scratch_operands = 1 : i64, tpu.core_type = #tpu.core_type<tc>, window_params = [{transform_indices = @transform_0, window_bounds = array<i64: 1, 16, 64>}, {pipeline_mode = #tpu.pipeline_mode<synchronous>, transform_indices = @transform_1, window_bounds = array<i64: 192, 256>}, {pipeline_mode = #tpu.pipeline_mode<synchronous>, transform_indices = @transform_2, window_bounds = array<i64: 1, 256>}, {transform_indices = @transform_3, window_bounds = array<i64: 1, 14, 128>}]} {
    %c0 = arith.constant 0 : index
    %c0_0 = arith.constant 0 : index
    %c0_1 = arith.constant 0 : index
    %0 = vector.load %arg1[%c0, %c0_0, %c0_1] : memref<1x16x64xbf16, #tpu.memory_space<vmem>>, vector<1x14x64xbf16>
    %1 = vector.shape_cast %0 : vector<1x14x64xbf16> to vector<14x64xbf16>
    %c0_2 = arith.constant 0 : index
    %c0_3 = arith.constant 0 : index
    %2 = vector.load %arg5[%c0_2, %c0_3] : memref<14x192xbf16, #tpu.memory_space<vmem>>, vector<14x64xbf16>
    tpu.vector_store %arg5[%c0_2, %c0_3], %1 {strides = array<i32>} : memref<14x192xbf16, #tpu.memory_space<vmem>>, vector<14x64xbf16>,
    %c0_4 = arith.constant 0 : index
    %c1 = arith.constant 1 : index
    %c0_5 = arith.constant 0 : index
    %3 = vector.load %arg1[%c0_4, %c1, %c0_5] : memref<1x16x64xbf16, #tpu.memory_space<vmem>>, vector<1x14x64xbf16>
    %4 = vector.shape_cast %3 : vector<1x14x64xbf16> to vector<14x64xbf16>
    %c0_6 = arith.constant 0 : index
    %c64 = arith.constant 64 : index
    %5 = vector.load %arg5[%c0_6, %c64] : memref<14x192xbf16, #tpu.memory_space<vmem>>, vector<14x64xbf16>
    tpu.vector_store %arg5[%c0_6, %c64], %4 {strides = array<i32>} : memref<14x192xbf16, #tpu.memory_space<vmem>>, vector<14x64xbf16>,
    %c0_7 = arith.constant 0 : index
    %c2 = arith.constant 2 : index
    %c0_8 = arith.constant 0 : index
    %6 = vector.load %arg1[%c0_7, %c2, %c0_8] : memref<1x16x64xbf16, #tpu.memory_space<vmem>>, vector<1x14x64xbf16>
    %7 = vector.shape_cast %6 : vector<1x14x64xbf16> to vector<14x64xbf16>
    %c0_9 = arith.constant 0 : index
    %c128 = arith.constant 128 : index
    %8 = vector.load %arg5[%c0_9, %c128] : memref<14x192xbf16, #tpu.memory_space<vmem>>, vector<14x64xbf16>
    tpu.vector_store %arg5[%c0_9, %c128], %7 {strides = array<i32>} : memref<14x192xbf16, #tpu.memory_space<vmem>>, vector<14x64xbf16>,
    %c0_10 = arith.constant 0 : index
    %c0_11 = arith.constant 0 : index
    %9 = vector.load %arg5[%c0_10, %c0_11] : memref<14x192xbf16, #tpu.memory_space<vmem>>, vector<14x192xbf16>
    %c0_12 = arith.constant 0 : index
    %c0_13 = arith.constant 0 : index
    %10 = vector.load %arg2[%c0_12, %c0_13] : memref<192x256xbf16, #tpu.memory_space<vmem>>, vector<192x256xbf16>
    %cst = arith.constant dense<0.000000e+00> : vector<14x256xf32>
    %11 = tpu.matmul %9, %10, %cst {dimension_numbers = #tpu.dot_dimension_numbers<[1], [0], [0], [1], [0, 0, 1, 1], [], []>} : vector<14x192xbf16>, vector<192x256xbf16>, vector<14x256xf32> -> vector<14x256xf32>
    %c0_14 = arith.constant 0 : index
    %c0_15 = arith.constant 0 : index
    %12 = vector.load %arg3[%c0_14, %c0_15] : memref<1x256xf32, #tpu.memory_space<vmem>>, vector<1x256xf32>
    %13 = vector.broadcast %12 : vector<1x256xf32> to vector<14x256xf32>
    %14 = arith.addf %11, %13 : vector<14x256xf32>
    %15 = vector.extract_strided_slice %14 {offsets = [0, 0], sizes = [14, 128], strides = [1, 1]} : vector<14x256xf32> to vector<14x128xf32>
    %16 = vector.extract_strided_slice %14 {offsets = [0, 128], sizes = [14, 128], strides = [1, 1]} : vector<14x256xf32> to vector<14x128xf32>
    %17 = arith.negf %16 : vector<14x128xf32>
    %18 = math.exp %17 : vector<14x128xf32>
    %cst_16 = arith.constant 1.000000e+00 : f32
    %19 = vector.broadcast %cst_16 : f32 to vector<14x128xf32>
    %20 = arith.addf %19, %18 : vector<14x128xf32>
    %21 = arith.divf %19, %20 : vector<14x128xf32>
    %22 = arith.mulf %15, %21 : vector<14x128xf32>
    %23 = arith.truncf %22 : vector<14x128xf32> to vector<14x128xbf16>
    %c0_17 = arith.constant 0 : index
    %c0_18 = arith.constant 0 : index
    %c0_19 = arith.constant 0 : index
    %24 = vector.load %arg4[%c0_17, %c0_18, %c0_19] : memref<1x14x128xbf16, #tpu.memory_space<vmem>>, vector<1x14x128xbf16>
    %25 = vector.shape_cast %24 : vector<1x14x128xbf16> to vector<14x128xbf16>
    %26 = vector.shape_cast %23 : vector<14x128xbf16> to vector<1x14x128xbf16>
    tpu.vector_store %arg4[%c0_17, %c0_18, %c0_19], %26 {strides = array<i32>} : memref<1x14x128xbf16, #tpu.memory_space<vmem>>, vector<1x14x128xbf16>,
    return
  }
  func.func @transform_0(%arg0: i32) -> (i32, i32, i32) {
    %c0_i32 = arith.constant 0 : i32
    %c0_i32_0 = arith.constant 0 : i32
    %c0_i32_1 = arith.constant 0 : i32
    return %arg0, %c0_i32, %c0_i32_0 : i32, i32, i32
  }
  func.func @transform_1(%arg0: i32) -> (i32, i32) {
    %c0_i32 = arith.constant 0 : i32
    %c0_i32_0 = arith.constant 0 : i32
    %c0_i32_1 = arith.constant 0 : i32
    return %c0_i32, %c0_i32_0 : i32, i32
  }
  func.func @transform_2(%arg0: i32) -> (i32, i32) {
    %c0_i32 = arith.constant 0 : i32
    %c0_i32_0 = arith.constant 0 : i32
    %c0_i32_1 = arith.constant 0 : i32
    return %c0_i32, %c0_i32_0 : i32, i32
  }
  func.func @transform_3(%arg0: i32) -> (i32, i32, i32) {
    %c0_i32 = arith.constant 0 : i32
    %c0_i32_0 = arith.constant 0 : i32
    %c0_i32_1 = arith.constant 0 : i32
    return %arg0, %c0_i32, %c0_i32_0 : i32, i32, i32
  }
}

</mosaic_0001>

<bundles_post_ra>
// kernel: tpu_custom_call.1
= control target key start
LH: loop header
LB: loop body
LE: loop exit
PB: predicated region body
PF: predicated region fallthrough
CT: control target
= control target key end

     0   :  { %8 = vsyncpa [#allocation4], 0  ;;  %s1139_s0 = inlined_call_operand.hbm [shape: bf16[2,16,64], index: 0, kind: input, shape index: {}]   ;;  %s1140_s1 = inlined_call_operand.hbm [shape: bf16[192,256], index: 1, kind: input, shape index: {}]   ;;  %s1141_s2 = inlined_call_operand.hbm [shape: f32[1,256], index: 2, kind: input, shape index: {}]   ;;  %s1142_s3 = inlined_call_operand.vmem [shape: bf16[2,14,128], index: 3, kind: output, shape index: {}]  }
   0x1   :  { %10 = vsyncpa [#allocation4 + $0x1], 0 }
   0x2   :  { %11 = vsyncpa [#allocation6], 0  ;;  %s1015_s12 = smov 0   ;;  %s1017_s13 = smov 0  }
   0x3   :  { %s1019_s14 = smov 0   ;;  %s1021_s15 = smov 0  }
   0x4 LB: > { %s1034_s16 = sadd.s32 4294967295, %s986_s15   ;;  %p37_p0 = scmp.ne.s32.totalorder %s978_s13, %s974_s12  ;;  %s986_s15 = sphi %s1021_s15, %s1151_s15   ;;  %s982_s14 = sphi %s1019_s14, %s1150_s14   ;;  %s978_s13 = sphi %s1017_s13, %s1149_s13   ;;  %s974_s12 = sphi %s1015_s12, %s1148_s12  }
   0x5   : > { %p38_p1 = scmp.eq.s32.totalorder %s1034_s16, 0  ;;  %p633_p2 = scmp.ge.s32.totalorder %s986_s15, 1 }
   0x6   : > { %p116_p3 = scmp.lt.s32.totalorder %s986_s15, 3  ;;  %s127_s20 = sshll.u32 %s1140_s1, 4  ;;  %s128_s20 = int_to_ptr.hbm [resolvable:$true] %s127_s20 }
   0x7   : > { %p1042_p4 = por %p38_p1, %p37_p0  ;;  %s988_s22 = smov [#allocation5]  }
   0x8   : > { %p1049_p5 = pnand %p633_p2, %p116_p3  ;;  %s129_s23 = sshll.u32 %s988_s22, 4  ;;  %s130_s23 = int_to_ptr.vmem [resolvable:$true] %s129_s23 }
   0x9   : > { %s142_s26 = sshll.u32 %s1141_s2, 4  ;;  %s989_s27 = smov 128   ;;  %s143_s26 = int_to_ptr.hbm [resolvable:$true] %s142_s26 }
   0xa   : > { %p795_p6 = pneg %p1049_p5  ;;  %s990_s28 = smov 8  }
   0xb   : > { %s991_s29 = smov [#allocation7]   ;;  %s1061_s4 = sadd.s32 1, %s986_s15  }
   0xc   : > { %p796_p7 = pnand %p795_p6, %p38_p1  ;;  %s144_s30 = sshll.u32 %s991_s29, 4  ;;  %s145_s30 = int_to_ptr.vmem [resolvable:$true] %s144_s30 }
   0xd   : > { %s24_s5 = sadd.s32 1, %s982_s14  ;;  %s21_s6 = ssub.s32 %s986_s15, %s1061_s4 }
   0xe   : > { %798 = dma.hbm_to_vmem [thread:$0]  (!%p796_p7), %s128_s20, 3072, %s130_s23, [#allocation6], %s989_s27, %s989_s27, %s990_s28  }
   0xf   : > { %801 = dma.hbm_to_vmem [thread:$0]  (!%p796_p7), %s143_s26, 32, %s145_s30, [#allocation6]  }
  0x10   : > { %p31_p8 = scmp.ne.s32.totalorder %s982_s14, %s978_s13  ;;  %p22_p9 = scmp.eq.s32.totalorder %s21_s6, 0 }
  0x11   : > { %p32_p10 = scmp.eq.s32.totalorder %s986_s15, 0  ;;  %p808_p11 = scmp.lt.s32.totalorder %s986_s15, 2 }
  0x12   : > { %s155_s7 = sand.u32 1, %s982_s14   ;;  %s757_s10 = sshll.u32 %s986_s15, 3 }
  0x13   : > { %s1072_s8 = scalar_select %p22_p9, %s982_s14, %s24_s5  }
  0x14   : > { %p33_p12 = por %p32_p10, %p31_p8  ;;  %s637_s9 = sshll.u32 %s155_s7, 3 }
  0x15   : > { %s164_s18 = scalar_lea.hbm %s1139_s0, %s757_s10  ;;  %s159_s20 = scalar_lea.vmem [#allocation3], %s637_s9 }
  0x16   : > { %s165_s19 = sshll.u32 %s164_s18, 4  ;;  %s167_s22 = sshll.u32 %s159_s20, 4  ;;  %s166_s19 = int_to_ptr.hbm [resolvable:$true] %s165_s19  ;;  %s168_s22 = int_to_ptr.vmem [resolvable:$true] %s167_s22 }
  0x17   : > { %p1078_p13 = pnand %p808_p11, %p33_p12  ;;  %s156_s24 = scalar_lea.sflag [#allocation4], %s155_s7 }
  0x18   : > { %s918_s25 = sshra.s32 %s166_s19, 4  ;;  %s925_s28 = scalar_lea.hbm %s1139_s0, 16  ;;  %s919_s25 = int_to_ptr.hbm [resolvable:$true] %s918_s25 }
  0x19   : > { %s920_s26 = scalar_lea.hbm %s919_s25, 8  ;;  %p922_p2 = pneg %p1078_p13 }
  0x1a   : > { %p921_p0 = scmp.ne.s32.totalorder %s919_s25, %s920_s26  ;;  %p926_p7 = scmp.lt.s32.totalorder %s919_s25, %s1139_s0 }
  0x1b   : > { %p927_p8 = scmp.lt.s32.totalorder %s925_s28, %s920_s26 }
  0x1c   : > { %p923_p3 = pnand %p922_p2, %p921_p0 }
  0x1d   : > { %p928_p9 = por %p927_p8, %p926_p7 }
  0x1e   : > { %p924_p6 = pneg %p923_p3 }
  0x20   : > { %p929_p10 = pnand %p928_p9, %p924_p6 }
  0x22   : > { %932 = shalt.err (!%p929_p10)
}
  0x23   : > { %s992_s5 = smov 64   ;;  %s993_s6 = smov 4  }
  0x24   : > { %805 = dma.hbm_to_vmem [thread:$0]  (!%p1078_p13), %s166_s19, 128, %s168_s22, %s156_s24, %s992_s5, %s992_s5, %s993_s6  }
  0x25   : > { %179 = sbr.rel (%p1049_p5) target bundleno = 366 (0x16e), region = 32  ;;  %s181_s7 = sand.u32 (!%p1049_p5), 1, %s978_s13  }
  0x26   : > { %s641_s9 = sshll.u32 (!%p1049_p5), %s181_s7, 3  ;;  %s182_s10 = scalar_lea.sflag (!%p1049_p5), [#allocation4], %s181_s7 }
  0x27   : > { %s1095_s11 = scalar_lea.vmem (!%p1049_p5), [#allocation3], %s641_s9 }
  0x2a   : > { %965 = dma.done.wait (%p1042_p4), %s182_s10, 128  }
  0x2b   : > { %967 = vsyncadd (%p1042_p4), %s182_s10, 4294967168 }
  0x2c   : > { %969 = dma.done.wait (%p38_p1), [#allocation6], 3104  }
  0x2d   : > { %971 = vsyncadd (%p38_p1), [#allocation6], 4294964192  ;;  %vm233_vm0 = vsmask.f32 3328  ;;  %v231_v0 = vld [vmem:[%s1095_s11] sm:$0xf] }
  0x2e   : > { %v232_v1 = vld [vmem:[%s1095_s11 + $0x4] sm:$0xf]  ;;  %v713_v2 = vld [vmem:[#allocation5 + $0x70] sm:$0xf]  ;;  %v237_v3 = vshrl.u32 %v231_v0, 16  ;;  %v240_v4 = vshll.u32 %v231_v0, 16 }
  0x2f   : > { %v246_v5 = vshll.u32 %v232_v1, 16  ;;  %v250_v6 = vshrl.u32 %v232_v1, 16  ;;  %v776_v7 = vld [vmem:[#allocation5 + $0x74] sm:$0xf0]  ;;  %v775_v9 = vld [vmem:[#allocation5 + $0x74] sm:$0xf] }
  0x30   : > { %v714_v8 = vor.u32 %v776_v7, %v713_v2  ;;  %v715_v10 = vld [vmem:[#allocation5 + $0x78] sm:$0xf0]  ;;  %v705_v11 = vld [vmem:[#allocation5 + $0x60] sm:$0xf]  ;;  %vm234_vm1 = vsmask.f32 7440 }
  0x31   : > { %v239_v12 = vrot.slane %v237_v3, 4  ;;  %v242_v13 = vrot.slane %v240_v4, 5  ;;  %v774_v14 = vld [vmem:[#allocation5 + $0x64] sm:$0xf0]  ;;  %v718_v15 = vor.u32 %v775_v9, %v715_v10  ;;  %v773_v17 = vld [vmem:[#allocation5 + $0x64] sm:$0xf]  ;;  %vm1109_vm4 = vmor %vm233_vm0, %vm234_vm1 }
  0x32   : > { %446 = vmatpush.bf16.msra.mxu0 %v714_v8  ;;  %v706_v16 = vor.u32 %v774_v14, %v705_v11  ;;  %v707_v18 = vld [vmem:[#allocation5 + $0x68] sm:$0xf0]  ;;  %vm269_vm2 = vcmask 1042432   ;;  %v248_v20 = vrot.slane %v246_v5, 5  ;;  %v697_v21 = vld [vmem:[#allocation5 + $0x50] sm:$0xf] }
  0x33   : > { %v243_v19 = vor.u32 %v242_v13, %v239_v12  ;;  %v772_v22 = vld [vmem:[#allocation5 + $0x54] sm:$0xf0]  ;;  %vm270_vm3 = vcmask 1046532   ;;  %v252_v24 = vrot.slane %v250_v6, 4  ;;  %474 = vmatpush.bf16.msra.mxu2 %v718_v15  ;;  %v710_v25 = vor.u32 %v773_v17, %v707_v18  ;;  %v783_v26 = vld [vmem:[#allocation5 + $0xb4] sm:$0xf] }
  0x34   : > { %v747_v27 = vld [vmem:[#allocation5 + $0xb8] sm:$0xf0]  ;;  %v771_v29 = vld [vmem:[#allocation5 + $0x54] sm:$0xf]  ;;  %v698_v32 = vor.u32 %v772_v22, %v697_v21  ;;  %v265_v33 = vld [vmem:[%s1095_s11] sm:$0xe] }
  0x35   : > { %v244_v28 = vrot.slane %v243_v19, 4  ;;  %v699_v30 = vld [vmem:[#allocation5 + $0x58] sm:$0xf0]  ;;  %v750_v31 = vor.u32 %v783_v26, %v747_v27  ;;  %vm271_vm5 = vmor %vm269_vm2, %vm270_vm3  ;;  %v689_v36 = vld [vmem:[#allocation5 + $0x40] sm:$0xf]  ;;  %v646_v38 = vrot.slane %v265_v33, 9  ;;  %v253_v40 = vor.u32 %v252_v24, %v248_v20 }
  0x36   : > { %447 = vmatpush.bf16.msra.mxu0 %v706_v16  ;;  %v266_v34 = vld [vmem:[%s1095_s11 + $0x4] sm:$0xf]  ;;  %v770_v37 = vld [vmem:[#allocation5 + $0x44] sm:$0xf0]  ;;  %s994_s17 = smov 64   ;;  %v702_v41 = vor.u32 %v771_v29, %v699_v30  ;;  %vm227_vm6 = vcmask 519168  }
  0x37   : > { %v249_v35 = vsel %vm1109_vm4, %v244_v28, %v248_v20  ;;  %492 = vmatpush.bf16.msra.mxu3 %v750_v31  ;;  %v274_v39 = vrot.slane %v266_v34, 5  ;;  %475 = vmatpush.bf16.msra.mxu2 %v710_v25  ;;  %v769_v42 = vld [vmem:[#allocation5 + $0x44] sm:$0xf]  ;;  %v691_v43 = vld [vmem:[#allocation5 + $0x48] sm:$0xf0]  ;;  %v690_v45 = vor.u32 %v770_v37, %v689_v36  ;;  %v254_v46 = vrot.slane %v253_v40, 4 }
  0x38   : > { %255 = vrot.lane.b32.xlu0 %v249_v35, %s994_s17  ;;  %v694_v47 = vor.u32 %v769_v42, %v691_v43  ;;  %v225_v48 = vld [vmem:[%s1095_s11] sm:$0xf]  ;;  %v781_v49 = vld [vmem:[#allocation5 + $0xa4] sm:$0xf]  ;;  %v739_v50 = vld [vmem:[#allocation5 + $0xa8] sm:$0xf0] }
  0x39   : > { %v275_v44 = vsel %vm271_vm5, %v646_v38, %v274_v39  ;;  %228 = vst.msk [vmem:[#allocation2] sm:$0xf] %vm227_vm6, %v225_v48  ;;  %v742_v51 = vor.u32 %v781_v49, %v739_v50  ;;  %v681_v52 = vld [vmem:[#allocation5 + $0x30] sm:$0xf]  ;;  %v768_v53 = vld [vmem:[#allocation5 + $0x34] sm:$0xf0] }
  0x3a   : > { %448 = vmatpush.bf16.msra.mxu0 %v698_v32  ;;  %279 = vst.msk [vmem:[#allocation2 + $0x4] sm:$0xf] %vm227_vm6, %v275_v44  ;;  %v767_v54 = vld [vmem:[#allocation5 + $0x34] sm:$0xf]  ;;  %v682_v55 = vor.u32 %v768_v53, %v681_v52  ;;  %v683_v56 = vld [vmem:[#allocation5 + $0x38] sm:$0xf0] }
  0x3b   : > { %476 = vmatpush.bf16.msra.mxu2 %v702_v41  ;;  %493 = vmatpush.bf16.msra.mxu3 %v742_v51  ;;  %v745_v57 = vld [vmem:[#allocation5 + $0xb0] sm:$0xf]  ;;  %v784_v58 = vld [vmem:[#allocation5 + $0xb4] sm:$0xf0]  ;;  %v686_v59 = vor.u32 %v767_v54, %v683_v56  ;;  %v779_v61 = vld [vmem:[#allocation5 + $0x94] sm:$0xf] }
  0x3c   : > { %v746_v60 = vor.u32 %v784_v58, %v745_v57  ;;  %v731_v62 = vld [vmem:[#allocation5 + $0x98] sm:$0xf0]  ;;  %v673_v63 = vld [vmem:[#allocation5 + $0x20] sm:$0xf]  ;;  %v766_v1 = vld [vmem:[#allocation5 + $0x24] sm:$0xf0] }
  0x3d   : > { %v734_v0 = vor.u32 %v779_v61, %v731_v62  ;;  %v765_v2 = vld [vmem:[#allocation5 + $0x24] sm:$0xf]  ;;  %v675_v3 = vld [vmem:[#allocation5 + $0x28] sm:$0xf0]  ;;  %v674_v4 = vor.u32 %v766_v1, %v673_v63  ;;  %vm229_vm7 = vcmask 518144   ;;  %v276_v6 = vrot.slane %v274_v39, 4 }
  0x3e   : > { %449 = vmatpush.bf16.msra.mxu0 %v690_v45  ;;  %464 = vmatpush.bf16.msra.mxu1 %v746_v60  ;;  %v678_v5 = vor.u32 %v765_v2, %v675_v3  ;;  %v226_v7 = vld [vmem:[%s1095_s11 + $0x4] sm:$0x7]  ;;  %v737_v8 = vld [vmem:[#allocation5 + $0xa0] sm:$0xf]  ;;  %v782_v9 = vld [vmem:[#allocation5 + $0xa4] sm:$0xf0] }
  0x3f   : > { %477 = vmatpush.bf16.msra.mxu2 %v694_v47  ;;  %494 = vmatpush.bf16.msra.mxu3 %v734_v0  ;;  %280 = vst.msk [vmem:[#allocation2 + $0xc] sm:$0x7] %vm229_vm7, %v276_v6  ;;  %v738_v10 = vor.u32 %v782_v9, %v737_v8  ;;  %v777_v11 = vld [vmem:[#allocation5 + $0x84] sm:$0xf]  ;;  %v723_v12 = vld [vmem:[#allocation5 + $0x88] sm:$0xf0] }
  0x40   : > { %257 = vrot.lane.b32.xlu0 %v254_v46, %s994_s17  ;;  %230 = vst.msk [vmem:[#allocation2 + $0x8] sm:$0x7] %vm229_vm7, %v226_v7  ;;  %v726_v13 = vor.u32 %v777_v11, %v723_v12  ;;  %v665_v14 = vld [vmem:[#allocation5 + $0x10] sm:$0xf]  ;;  %v764_v15 = vld [vmem:[#allocation5 + $0x14] sm:$0xf0] }
  0x41   : > { %v666_v16 = vor.u32 %v764_v15, %v665_v14  ;;  %v763_v17 = vld [vmem:[#allocation5 + $0x14] sm:$0xf]  ;;  %v667_v18 = vld [vmem:[#allocation5 + $0x18] sm:$0xf0]  ;;  %v759_v20 = vld [vmem:[#allocation2 + $0x4] sm:$0xf] }
  0x42   : > { %450 = vmatpush.bf16.msra.mxu0 %v682_v55  ;;  %465 = vmatpush.bf16.msra.mxu1 %v738_v10  ;;  %v670_v19 = vor.u32 %v763_v17, %v667_v18  ;;  %v729_v21 = vld [vmem:[#allocation5 + $0x90] sm:$0xf]  ;;  %v780_v22 = vld [vmem:[#allocation5 + $0x94] sm:$0xf0]  ;;  %v657_v24 = vld [vmem:[#allocation5] sm:$0xf] }
  0x43   : > { %478 = vmatpush.bf16.msra.mxu2 %v686_v59  ;;  %495 = vmatpush.bf16.msra.mxu3 %v726_v13  ;;  %v730_v23 = vor.u32 %v780_v22, %v729_v21  ;;  %v762_v25 = vld [vmem:[#allocation5 + $0x4] sm:$0xf0]  ;;  %v761_v26 = vld [vmem:[#allocation5 + $0x4] sm:$0xf]  ;;  %v659_v28 = vld [vmem:[#allocation5 + $0x8] sm:$0xf0] }
  0x44   : > { %v658_v27 = vor.u32 %v762_v25, %v657_v24  ;;  %v721_v29 = vld [vmem:[#allocation5 + $0x80] sm:$0xf]  ;;  %v778_v30 = vld [vmem:[#allocation5 + $0x84] sm:$0xf0]  ;;  %v662_v31 = vor.u32 %v761_v26, %v659_v28  ;;  %vm442_vm8 = vcmask 523264   ;;  %vm261_vm9 = vcmask 1043968  }
  0x45   : > { %v722_v32 = vor.u32 %v778_v30, %v721_v29  ;;  %vm263_vm10 = vcmask 1042944   ;;  %v307_v40 = vld [vmem:[#allocation7] sm:$0x3]  ;;  %p219_p1 = scmp.lt.s32.totalorder %s1034_s16, 1 }
  0x46   : > { %451 = vmatpush.bf16.msra.mxu0 %v674_v4  ;;  %466 = vmatpush.bf16.msra.mxu1 %v730_v23  ;;  %v651_v33 = vld [vmem:[#allocation2 + $0x8] sm:$0x70]  ;;  %v310_v41 = vperm.slane %v307_v40, 1  ;;  %v309_v58 = vperm.slane %v307_v40, 0 }
  0x47   : > { %479 = vmatpush.bf16.msra.mxu2 %v678_v5  ;;  %v654_v34 = vor.u32 %v759_v20, %v651_v33  ;;  %s1153_s16 = smov (!%p219_p1, %s1034_s16), 1 }
  0x48   : > { %s758_s21 = sshll.u32 %s1153_s16, 3 }
  0x49   : > { %752 = vmatmul.msk.bf16.vlgmr.msra.gmra.mxu3 %vm442_vm8, %v654_v34  ;;  %s223_s19 = scalar_lea.vmem %s1142_s3, %s758_s21 }
  0x4a   : > { %452 = vmatpush.bf16.msra.mxu0 %v666_v16  ;;  %467 = vmatpush.bf16.msra.mxu1 %v722_v32 }
  0x4b   : > { %480 = vmatpush.bf16.msra.mxu2 %v670_v19 }
  0x4d   : > { %751 = vmatmul.msk.bf16.vlgmr.msra.gmra.mxu1 %vm442_vm8, %v654_v34 }
  0x4e   : > { %453 = vmatpush.bf16.msra.mxu0 %v658_v27 }
  0x4f   : > { %481 = vmatpush.bf16.msra.mxu2 %v662_v31 }
  0xaa   : > { %v256_v35 = vpop.permute.xlu0 %255 }
  0xab   : > { %262 = vst.msk [vmem:[#allocation2] sm:$0xf] %vm261_vm9, %v256_v35 }
  0xb2   : > { %v258_v36 = vpop.permute.xlu0 %257  ;;  %v649_v37 = vld [vmem:[#allocation2] sm:$0xf] }
  0xb3   : > { %264 = vst.msk [vmem:[#allocation2 + $0x8] sm:$0x7] %vm263_vm10, %v258_v36 }
  0xba   : > { %v760_v38 = vld [vmem:[#allocation2 + $0x4] sm:$0x70] }
  0xbb   : > { %v650_v39 = vor.u32 %v760_v38, %v649_v37 }
  0xbd   : > { %454 = vmatmul.bf16.vlgmr.msra.gmra.mxu0 %v650_v39  ;;  %482 = vmatmul.bf16.vlgmr.msra.gmra.mxu2 %v650_v39 }
  0xca   : > { %v469_v61 = vpop.f32.mrf.mxu1 }
  0xcc   : > { %v497_v42 = vpop.f32.mrf.mxu3 }
  0xd2   : > { %v471_v17 = vpop.f32.mrf.mxu1 }
  0xd4   : > { %v499_v49 = vpop.f32.mrf.mxu3 }
 0x13a   : > { %v455_v55 = vpop.f32.mrf.mxu0 }
 0x13b   : > { %v456_v63 = vadd.f32 %v455_v55, %v309_v58 }
 0x13d   : > { %v470_v5 = vadd.f32 %v469_v61, %v456_v63 }
 0x140   : > { %v483_v43 = vpop.f32.mrf.mxu2 }
 0x141   : > { %v484_v44 = vadd.f32 %v483_v43, %v310_v41 }
 0x142   : > { %v457_v7 = vpop.f32.mrf.mxu0 }
 0x143   : > { %v498_v45 = vadd.f32 %v497_v42, %v484_v44  ;;  %v458_v12 = vadd.f32 %v457_v7, %v309_v58 }
 0x145   : > { %v753_v46 = vmul.f32 -1.442695, %v498_v45  ;;  %v472_v20 = vadd.f32 %v471_v17, %v458_v12 }
 0x147   : > { %850 = vpow2.f32 %v753_v46 }
 0x148   : > { %v485_v47 = vpop.f32.mrf.mxu2 }
 0x149   : > { %v486_v48 = vadd.f32 %v485_v47, %v310_v41 }
 0x14b   : > { %v500_v50 = vadd.f32 %v499_v49, %v486_v48 }
 0x14d   : > { %v851_v51 = vpop.eup %850  ;;  %v754_v52 = vmul.f32 -1.442695, %v500_v50 }
 0x14e   : > { %v508_v53 = vadd.f32 1.0, %v851_v51 }
 0x14f   : > { %852 = vpow2.f32 %v754_v52 }
 0x150   : > { %854 = vrcp.f32 %v508_v53  ;;  %v521_v62 = vand.u32 2147483648, %v508_v53  ;;  %v519_v1 = vand.u32 2147483647, %v508_v53  ;;  %vm515_vm12 = vweird.f32 %v508_v53 }
 0x152   : > { %v522_v4 = vor.u32 1.1754944e-38, %v521_v62  ;;  %vm520_vm14 = vcmp.eq.f32.partialorder %v519_v1, 8.507059e+37 }
 0x155   : > { %v853_v54 = vpop.eup %852 }
 0x156   : > { %v855_v56 = vpop.eup %854  ;;  %v509_v57 = vadd.f32 1.0, %v853_v54 }
 0x157   : > { %v511_v59 = vmul.f32 %v855_v56, %v508_v53  ;;  %vm516_vm11 = vweird.f32 %v855_v56 }
 0x158   : > { %856 = vrcp.f32 %v509_v57  ;;  %vm517_vm13 = vmor %vm515_vm12, %vm516_vm11  ;;  %v536_v13 = vand.u32 2147483648, %v509_v57  ;;  %v534_v16 = vand.u32 2147483647, %v509_v57  ;;  %vm530_vm0 = vweird.f32 %v509_v57 }
 0x159   : > { %v512_v60 = vsub.f32 1.0, %v511_v59 }
 0x15a   : > { %v537_v19 = vor.u32 1.1754944e-38, %v536_v13  ;;  %vm535_vm2 = vcmp.eq.f32.partialorder %v534_v16, 8.507059e+37 }
 0x15b   : > { %v513_v0 = vmul.f32 %v855_v56, %v512_v60 }
 0x15d   : > { %v514_v2 = vadd.f32 %v855_v56, %v513_v0 }
 0x15e   : > { %v857_v3 = vpop.eup %856 }
 0x15f   : > { %v518_v6 = vsel %vm517_vm13, %v855_v56, %v514_v2  ;;  %v526_v8 = vmul.f32 %v857_v3, %v509_v57  ;;  %vm531_vm15 = vweird.f32 %v857_v3 }
 0x160   : > { %v523_v9 = vsel %vm520_vm14, %v522_v4, %v518_v6  ;;  %vm532_vm1 = vmor %vm530_vm0, %vm531_vm15 }
 0x161   : > { %v540_v10 = vmul.f32 %v523_v9, %v470_v5  ;;  %v527_v11 = vsub.f32 1.0, %v526_v8 }
 0x163   : > { %v542_v14 = vpack.c.bf16 %v540_v10, %v540_v10  ;;  %v528_v15 = vmul.f32 %v857_v3, %v527_v11 }
 0x165   : > { %544 = vst [vmem:[%s223_s19] sm:$0xf] %v542_v14  ;;  %v529_v18 = vadd.f32 %v857_v3, %v528_v15 }
 0x167   : > { %v533_v21 = vsel %vm532_vm1, %v857_v3, %v529_v18 }
 0x168   : > { %v538_v22 = vsel %vm535_vm2, %v537_v19, %v533_v21 }
 0x169   : > { %v541_v23 = vmul.f32 %v538_v22, %v472_v20 }
 0x16b   : > { %v543_v24 = vpack.c.bf16 %v541_v23, %v541_v23 }
 0x16d   : > { %545 = vst [vmem:[%s223_s19 + $0x4] sm:$0x7] %v543_v24 }
 0x16e PF: > { %p14_p4 = scmp.ge.s32.totalorder %s1061_s4, 4   ;;  %s1148_s12 = smov %s978_s13 }
 0x16f   : > { %s1149_s13 = smov %s982_s14  ;;  %s1150_s14 = smov %s1072_s8 }
 0x170   : > { %s1151_s15 = smov %s1061_s4  ;;  %16 = sbr.rel (!%p14_p4) target bundleno = 4 (0x4), region = 80 }
 0x175   :  { %567 = vsyncpa [#allocation4], 1 }
 0x176   :  { %569 = vsyncpa [#allocation4 + $0x1], 1 }
 0x177   :  { %570 = vsyncpa [#allocation6], 1 }

</bundles_post_ra>
